<compile_context>
chip_gen: v6e
topology: v6e:2x2x1
jax: 0.10.0
libtpu: 0.0.40
codegen_flags: <defaults>
</compile_context>

<pallas_src>
import jax
import jax.numpy as jnp
from jax.experimental import pallas as pl
from jax.experimental.pallas import tpu as pltpu

_BLOCK_BUDGET_BYTES = 4 * 1024 * 1024  # per-block budget (2 arrays x 2 bufs x 4 MiB = 16 MiB)
_VMEM_LIMIT_BYTES = 32 * 1024 * 1024   # explicit scoped-VMEM limit, safe on v5e/v6e/v7x


def _copy_kernel(x_ref, o_ref):
    # Plain 2D tile copy: lane-dense, unmasked vld/vst, no relayout, no compute.
    o_ref[...] = x_ref[...]


def _choose_tiles(n, flat, dtype):
    """Pick (tb, tf) tiles for the (n, flat) copy.

    Guarantees:
      * tb * tf * itemsize <= _BLOCK_BUDGET_BYTES,
      * tf is the full `flat` dim or a multiple of 128 (ragged last block OK),
      * tb is the full `n` dim or a multiple of the packed-sublane quantum,
      * lanes are filled before rows (long contiguous DMA bursts).
    """
    itemsize = jnp.dtype(dtype).itemsize
    sub = max(8, 32 // itemsize)                 # sublane quantum: 8 f32 / 16 bf16 / 32 i8
    budget = _BLOCK_BUDGET_BYTES // itemsize     # budget in elements

    # Whole array fits in one block -> full-extent block on both dims (always legal).
    if n * flat <= budget:
        return n, flat

    # Lanes first: widest tf that still leaves room for >= `sub` rows in-budget.
    if flat <= budget // sub:
        tf = flat                                # full-extent lane dim (legal even if not %128)
    else:
        tf = max(128, ((budget // sub) // 128) * 128)  # 128-multiple; ragged last block is fine
        tf = min(tf, flat)

    # Rows: as many as fit the remaining budget, rounded to the sublane quantum.
    rows = budget // tf                          # >= sub by construction of tf
    if rows >= n:
        tb = n
    else:
        tb = max(sub, (rows // sub) * sub)

    return tb, tf


@jax.jit
def flatten(x: jax.Array) -> jax.Array:
    """Pallas equivalent of torch `x.view(x.size(0), -1)` for any rank >= 1."""
    n = x.shape[0]
    flat = 1
    for d in x.shape[1:]:
        flat *= d

    # The actual flatten: metadata-only reshape for a contiguous row-major
    # array; the kernel below is a lane-dense identity copy of the 2D view.
    x2d = x.reshape(n, flat)

    tb, tf = _choose_tiles(n, flat, x.dtype)
    grid = (pl.cdiv(n, tb), pl.cdiv(flat, tf))

    itemsize = jnp.dtype(x.dtype).itemsize
    cost = pl.CostEstimate(
        flops=0,
        transcendentals=0,
        bytes_accessed=2 * n * flat * itemsize,
    )

    return pl.pallas_call(
        _copy_kernel,
        out_shape=jax.ShapeDtypeStruct((n, flat), x.dtype),
        grid_spec=pltpu.PrefetchScalarGridSpec(
            num_scalar_prefetch=0,
            grid=grid,
            in_specs=[pl.BlockSpec((tb, tf), lambda i, j: (i, j))],
            out_specs=pl.BlockSpec((tb, tf), lambda i, j: (i, j)),
        ),
        cost_estimate=cost,
        compiler_params=pltpu.CompilerParams(
            dimension_semantics=("parallel", "parallel"),
            vmem_limit_bytes=_VMEM_LIMIT_BYTES,
        ),
    )(x2d)


if __name__ == "__main__":
    key = jax.random.PRNGKey(0)

    # Small NCHW input consistent with a conv-style tensor fed to Flatten.
    x = jax.random.normal(key, (2, 4, 16, 16), dtype=jnp.float32)
    y = flatten(x)
    jax.block_until_ready(y)
    y_ref = x.reshape(x.shape[0], -1)
    assert y.shape == (2, 4 * 16 * 16), y.shape
    assert jnp.array_equal(y, y_ref), "Flatten kernel mismatch (4D)"

    # Non-4D input (nn.Flatten-style .view accepts any rank >= 1).
    x3 = jax.random.normal(jax.random.PRNGKey(1), (4, 8, 96), dtype=jnp.float32)
    y3 = flatten(x3)
    jax.block_until_ready(y3)
    assert jnp.array_equal(y3, x3.reshape(4, -1)), "Flatten kernel mismatch (3D)"

    # bf16 input exercises the packed-sublane quantum path.
    xb = jax.random.normal(jax.random.PRNGKey(2), (8, 2, 8, 32), dtype=jnp.bfloat16)
    yb = flatten(xb)
    jax.block_until_ready(yb)
    assert jnp.array_equal(yb, xb.reshape(8, -1)), "Flatten kernel mismatch (bf16)"

    print("KERNEL_OK")
</pallas_src>

<mosaic_0001>
module attributes {stable_mosaic.version = 11 : i64} {
  func.func @_copy_kernel(%arg0: i32, %arg1: i32, %arg2: memref<2x1024xf32, #tpu.memory_space<vmem>>, %arg3: memref<2x1024xf32, #tpu.memory_space<vmem>>) attributes {dimension_semantics = [#tpu.dimension_semantics<parallel>, #tpu.dimension_semantics<parallel>], iteration_bounds = array<i64: 1, 1>, scalar_prefetch = 0 : i64, scratch_operands = 0 : i64, tpu.core_type = #tpu.core_type<tc>, window_params = [{transform_indices = @transform_0, window_bounds = array<i64: 2, 1024>}, {transform_indices = @transform_1, window_bounds = array<i64: 2, 1024>}]} {
    %c0 = arith.constant 0 : index
    %c0_0 = arith.constant 0 : index
    %0 = vector.load %arg2[%c0, %c0_0] : memref<2x1024xf32, #tpu.memory_space<vmem>>, vector<2x1024xf32>
    %c0_1 = arith.constant 0 : index
    %c0_2 = arith.constant 0 : index
    %1 = vector.load %arg3[%c0_1, %c0_2] : memref<2x1024xf32, #tpu.memory_space<vmem>>, vector<2x1024xf32>
    tpu.vector_store %arg3[%c0_1, %c0_2], %0 {strides = array<i32>} : memref<2x1024xf32, #tpu.memory_space<vmem>>, vector<2x1024xf32>,
    return
  }
  func.func @transform_0(%arg0: i32, %arg1: i32) -> (i32, i32) {
    %c0_i32 = arith.constant 0 : i32
    return %arg0, %arg1 : i32, i32
  }
  func.func @transform_1(%arg0: i32, %arg1: i32) -> (i32, i32) {
    %c0_i32 = arith.constant 0 : i32
    return %arg0, %arg1 : i32, i32
  }
}

</mosaic_0001>

<bundles_post_ra>
// kernel: flatten.1
= control target key start
LH: loop header
LB: loop body
LE: loop exit
PB: predicated region body
PF: predicated region fallthrough
CT: control target
= control target key end

     0   :  { %s70_s0 = inlined_call_operand.vmem [shape: f32[2,1024], index: 0, kind: input, shape index: {}]   ;;  %s71_s1 = inlined_call_operand.hbm [shape: f32[2,1024], index: 1, kind: output, shape index: {}]  }
   0x1   :  { %v9_v0 = vld [vmem:[%s70_s0] sm:$0xff]  ;;  %v10_v1 = vld [vmem:[%s70_s0 + $0x8] sm:$0xff] }
   0x2   :  { %6 = vsyncpa [#allocation3], 0  ;;  %11 = vst [vmem:[#allocation2] sm:$0xff] %v9_v0  ;;  %s50_s10 = smov [#allocation2]  }
   0x3   :  { %12 = vst [vmem:[#allocation2 + $0x8] sm:$0xff] %v10_v1  ;;  %s19_s11 = sshll.u32 %s50_s10, 4  ;;  %s20_s11 = int_to_ptr.vmem [resolvable:$true] %s19_s11 }
   0x4   :  { %s28_s12 = scalar_lea.vmem %s20_s11, 256  ;;  %p33_p1 = scmp.lt.s32.totalorder %s20_s11, %s20_s11 }
   0x5   :  { %p29_p0 = scmp.ne.s32.totalorder %s20_s11, %s28_s12  ;;  %p34_p2 = scmp.lt.s32.totalorder %s28_s12, %s28_s12 }
   0x7   :  { %p35_p3 = por %p34_p2, %p33_p1 }
   0x9   :  { %p36_p4 = pnand %p35_p3, %p29_p0 }
   0xb   :  { %39 = shalt.err (!%p36_p4)
}
   0xc   :  { %22 = dma.vmem_to_hbm [thread:$0]  %s20_s11, 256, %s71_s1, [#allocation3]  }
   0xd   :  { %48 = dma.done.wait [#allocation3], 256  }
   0xe   :  { %49 = vsyncadd [#allocation3], 4294967040 }
   0xf   :  { %26 = vsyncpa [#allocation3], 1 }

</bundles_post_ra>
